<compile_context>
chip_gen: v6e
topology: v6e:2x2x1
jax: 0.10.0
libtpu: 0.0.40
codegen_flags: <defaults>
</compile_context>

<pallas_src>
import numpy as np

import jax
import jax.numpy as jnp
from jax.experimental import pallas as pl
from jax.experimental.pallas import tpu as pltpu


# ------------------------------ fused kernel -------------------------------

def _mnist_fused_kernel(x_ref, w1_ref, b1_ref, w2_ref, b2_ref,
                        fc1w_ref, fc1b_ref, fc2w_ref, fc2b_ref,
                        fc3w_ref, fc3b_ref, o_ref):
    f32 = jnp.float32
    mxu_dt = w1_ref.dtype

    def dot(a, b):
        return jnp.dot(a, b, preferred_element_type=f32)

    x = x_ref[...]                                          # (Nb, Ci*H*W) bf16

    # ---- conv1 + bias + ReLU + 2x2 max-pool: 4 pool-folded GEMMs + VPU max --
    a = dot(x, w1_ref[0])
    for k in range(1, 4):
        a = jnp.maximum(a, dot(x, w1_ref[k]))
    p1 = jnp.maximum(a + b1_ref[...], 0.0).astype(mxu_dt)   # (Nb, Hp1*Wp1*Co1)

    # ---- conv2 + bias + ReLU + 2x2 max-pool ----
    a = dot(p1, w2_ref[0])
    for k in range(1, 4):
        a = jnp.maximum(a, dot(p1, w2_ref[k]))
    p2 = jnp.maximum(a + b2_ref[...], 0.0).astype(mxu_dt)   # (Nb, Hp2*Wp2*Co2)

    # ---- fc1 / fc2 (+ReLU), fc3 : single batched GEMMs ----
    h = jnp.maximum(dot(p2, fc1w_ref[...]) + fc1b_ref[...], 0.0).astype(mxu_dt)
    h = jnp.maximum(dot(h, fc2w_ref[...]) + fc2b_ref[...], 0.0).astype(mxu_dt)
    z = dot(h, fc3w_ref[...]) + fc3b_ref[...]               # (Nb, n_classes) f32

    # ---- log_softmax (f32 epilogue), one batched store ----
    m = jnp.max(z, axis=-1, keepdims=True)
    zs = z - m
    lse = jnp.log(jnp.sum(jnp.exp(zs), axis=-1, keepdims=True))
    o_ref[...] = (zs - lse).astype(o_ref.dtype)


# --------------------------- one-time weight pack ---------------------------

def _dense_conv_matrix(w, H, W, channels_last_input):
    """Pack a (Co,Ci,K,K) VALID conv into a dense (Ci*H*W, Ho*Wo*Co) matrix."""
    Co, Ci, K, _ = w.shape
    Ho, Wo = H - K + 1, W - K + 1
    M = np.zeros((Ci * H * W, Ho * Wo * Co), np.float32)
    w = np.asarray(w, np.float32)
    for ci in range(Ci):
        for kh in range(K):
            for kw in range(K):
                for oh in range(Ho):
                    ih = oh + kh
                    for ow in range(Wo):
                        iw = ow + kw
                        if channels_last_input:
                            row = (ih * W + iw) * Ci + ci
                        else:
                            row = ci * H * W + ih * W + iw
                        col = (oh * Wo + ow) * Co
                        M[row, col:col + Co] += w[:, ci, kh, kw]
    return M


def _pool_selector(Ho, Wo, Co, di, dj):
    """0/1 matrix picking pool tap (di,dj): (Ho*Wo*Co,) -> (Hp*Wp*Co,)."""
    Hp, Wp = Ho // 2, Wo // 2
    S = np.zeros((Ho * Wo * Co, Hp * Wp * Co), np.float32)
    eye = np.eye(Co, dtype=np.float32)
    for i in range(Hp):
        for j in range(Wp):
            r = ((2 * i + di) * Wo + (2 * j + dj)) * Co
            c = (i * Wp + j) * Co
            S[r:r + Co, c:c + Co] = eye
    return S


def pack_params(params, spatial, matmul_dtype=jnp.bfloat16):
    """Pre-pack PyTorch-layout parameters into MXU-friendly operands (once)."""
    c1w = np.asarray(params["conv1_w"], np.float32)
    c1b = np.asarray(params["conv1_b"], np.float32)
    c2w = np.asarray(params["conv2_w"], np.float32)
    c2b = np.asarray(params["conv2_b"], np.float32)
    Co1, _, K, _ = c1w.shape
    Co2 = c2w.shape[0]
    Ho1 = spatial - K + 1          # after conv1
    Hp1 = Ho1 // 2                 # after pool1
    Ho2 = Hp1 - K + 1              # after conv2
    Hp2 = Ho2 // 2                 # after pool2

    def conv_pool_weight(wd, Ho, Co):
        # Fold each of the 4 pool taps into the dense conv weight.
        return np.stack([wd @ _pool_selector(Ho, Ho, Co, di, dj)
                         for di in range(2) for dj in range(2)])

    wd1 = _dense_conv_matrix(c1w, spatial, spatial, channels_last_input=False)
    wd2 = _dense_conv_matrix(c2w, Hp1, Hp1, channels_last_input=True)

    fc1_w = np.asarray(params["fc1_w"], np.float32)
    hidden = fc1_w.shape[0]
    assert fc1_w.shape[1] == Co2 * Hp2 * Hp2, "fc1 in_features mismatch"
    # torch.flatten order is (c, i, j); the kernel's p2 lanes are (i, j, c):
    fc1_perm = fc1_w.reshape(hidden, Co2, Hp2, Hp2).transpose(0, 2, 3, 1)
    fc1_perm = fc1_perm.reshape(hidden, -1)

    md = matmul_dtype
    return {
        "w1": jnp.asarray(conv_pool_weight(wd1, Ho1, Co1), md),
        "b1": jnp.asarray(np.tile(c1b, Hp1 * Hp1)[None, :], jnp.float32),
        "w2": jnp.asarray(conv_pool_weight(wd2, Ho2, Co2), md),
        "b2": jnp.asarray(np.tile(c2b, Hp2 * Hp2)[None, :], jnp.float32),
        "fc1w": jnp.asarray(fc1_perm.T, md),
        "fc1b": jnp.asarray(params["fc1_b"], jnp.float32)[None, :],
        "fc2w": jnp.asarray(np.asarray(params["fc2_w"], np.float32).T, md),
        "fc2b": jnp.asarray(params["fc2_b"], jnp.float32)[None, :],
        "fc3w": jnp.asarray(np.asarray(params["fc3_w"], np.float32).T, md),
        "fc3b": jnp.asarray(params["fc3_b"], jnp.float32)[None, :],
    }


# ------------------------------ forward wrapper -----------------------------

_WEIGHT_ORDER = ("w1", "b1", "w2", "b2", "fc1w", "fc1b",
                 "fc2w", "fc2b", "fc3w", "fc3b")


def _pick_block_rows(n):
    for nb in (128, 64, 32, 16, 8):
        if n % nb == 0:
            return nb
    return n


def _resident_spec(arr):
    zero = (0,) * arr.ndim
    return pl.BlockSpec(arr.shape, lambda i, _z=zero: _z)


def _forward_impl(x_nchw, packed, block_rows=None):
    n = x_nchw.shape[0]
    mxu_dt = packed["w1"].dtype
    # torch.flatten-order (c, h, w) rows; channel order is already folded into
    # the packed conv1 weight, so no NCHW->NHWC transpose is needed.
    x2d = x_nchw.reshape(n, -1).astype(mxu_dt)
    f_in = x2d.shape[1]
    n_classes = packed["fc3b"].shape[1]

    nb = block_rows if (block_rows and n % block_rows == 0) else _pick_block_rows(n)
    grid = (n // nb,)

    in_specs = [pl.BlockSpec((nb, f_in), lambda i: (i, 0))]
    in_specs += [_resident_spec(packed[k]) for k in _WEIGHT_ORDER]

    return pl.pallas_call(
        _mnist_fused_kernel,
        out_shape=jax.ShapeDtypeStruct((n, n_classes), jnp.float32),
        grid=grid,
        in_specs=in_specs,
        out_specs=pl.BlockSpec((nb, n_classes), lambda i: (i, 0)),
        compiler_params=pltpu.CompilerParams(
            dimension_semantics=("parallel",)),
    )(x2d, *(packed[k] for k in _WEIGHT_ORDER))


mnist_nn_forward = jax.jit(_forward_impl, static_argnames=("block_rows",))


# ------------------------------- reference ----------------------------------

def reference_forward(x_nchw, params):
    dn = ("NCHW", "OIHW", "NCHW")
    y = jax.lax.conv_general_dilated(x_nchw, params["conv1_w"], (1, 1), "VALID",
                                     dimension_numbers=dn)
    y = jax.nn.relu(y + params["conv1_b"][None, :, None, None])
    y = jax.lax.reduce_window(y, -jnp.inf, jax.lax.max, (1, 1, 2, 2), (1, 1, 2, 2), "VALID")
    y = jax.lax.conv_general_dilated(y, params["conv2_w"], (1, 1), "VALID",
                                     dimension_numbers=dn)
    y = jax.nn.relu(y + params["conv2_b"][None, :, None, None])
    y = jax.lax.reduce_window(y, -jnp.inf, jax.lax.max, (1, 1, 2, 2), (1, 1, 2, 2), "VALID")
    y = y.reshape(y.shape[0], -1)
    y = jax.nn.relu(y @ params["fc1_w"].T + params["fc1_b"])
    y = jax.nn.relu(y @ params["fc2_w"].T + params["fc2_b"])
    z = y @ params["fc3_w"].T + params["fc3_b"]
    return jax.nn.log_softmax(z, axis=-1)


def init_params(key, in_channels, hidden_channels, output_channels,
                num_features, subSampling, kernel_size):
    # Deterministic synthetic parameters with PyTorch-shaped tensors
    # (Conv2d: (Cout, Cin, K, K), Linear: (out, in)), uniform(-1/sqrt(fan_in), ..).
    K = kernel_size
    fc1_in = subSampling * (K - 1) ** 2
    ks = jax.random.split(key, 10)

    def u(k, shape, fan_in):
        bound = 1.0 / float(fan_in) ** 0.5
        return jax.random.uniform(k, shape, jnp.float32, -bound, bound)

    return {
        "conv1_w": u(ks[0], (num_features, in_channels, K, K), in_channels * K * K),
        "conv1_b": u(ks[1], (num_features,), in_channels * K * K),
        "conv2_w": u(ks[2], (subSampling, num_features, K, K), num_features * K * K),
        "conv2_b": u(ks[3], (subSampling,), num_features * K * K),
        "fc1_w": u(ks[4], (hidden_channels, fc1_in), fc1_in),
        "fc1_b": u(ks[5], (hidden_channels,), fc1_in),
        "fc2_w": u(ks[6], (50, hidden_channels), hidden_channels),
        "fc2_b": u(ks[7], (50,), hidden_channels),
        "fc3_w": u(ks[8], (output_channels, 50), 50),
        "fc3_b": u(ks[9], (output_channels,), 50),
    }


if __name__ == "__main__":
    in_channels, hidden_channels, output_channels = 1, 32, 10
    num_features, subSampling, kernel_size = 4, 8, 3
    batch, spatial = 16, 14   # 14 -> conv 12 -> pool 6 -> conv 4 -> pool 2

    key = jax.random.PRNGKey(0)
    pkey, xkey = jax.random.split(key)
    params = init_params(pkey, in_channels, hidden_channels, output_channels,
                         num_features, subSampling, kernel_size)
    packed = pack_params(params, spatial)
    x = jax.random.normal(xkey, (batch, in_channels, spatial, spatial), jnp.float32)

    # block_rows=8 -> grid=(2,) so the batch grid axis / pipelining is exercised.
    out = mnist_nn_forward(x, packed, block_rows=8)
    out = jax.block_until_ready(out)

    assert out.shape == (batch, output_channels), out.shape
    assert bool(jnp.all(jnp.isfinite(out)))
    # log_softmax rows must exponentiate-sum to 1
    assert bool(jnp.allclose(jnp.sum(jnp.exp(out), axis=1), 1.0, atol=1e-4))
    # match the pure-JAX (== PyTorch) f32 reference (bf16 matmul operands)
    ref = reference_forward(x, params)
    assert bool(jnp.allclose(out, ref, atol=3e-2, rtol=3e-2)), \
        float(jnp.max(jnp.abs(out - ref)))
    print("KERNEL_OK")
</pallas_src>

<mosaic_0001>
module attributes {stable_mosaic.version = 11 : i64} {
  func.func @_mnist_fused_kernel(%arg0: i32, %arg1: memref<8x196xbf16, #tpu.memory_space<vmem>>, %arg2: memref<4x196x144xbf16, #tpu.memory_space<vmem>>, %arg3: memref<1x144xf32, #tpu.memory_space<vmem>>, %arg4: memref<4x144x32xbf16, #tpu.memory_space<vmem>>, %arg5: memref<1x32xf32, #tpu.memory_space<vmem>>, %arg6: memref<32x32xbf16, #tpu.memory_space<vmem>>, %arg7: memref<1x32xf32, #tpu.memory_space<vmem>>, %arg8: memref<32x50xbf16, #tpu.memory_space<vmem>>, %arg9: memref<1x50xf32, #tpu.memory_space<vmem>>, %arg10: memref<50x10xbf16, #tpu.memory_space<vmem>>, %arg11: memref<1x10xf32, #tpu.memory_space<vmem>>, %arg12: memref<8x10xf32, #tpu.memory_space<vmem>>) attributes {dimension_semantics = [#tpu.dimension_semantics<parallel>], iteration_bounds = array<i64: 2>, scalar_prefetch = 0 : i64, scratch_operands = 0 : i64, tpu.core_type = #tpu.core_type<tc>, window_params = [{transform_indices = @transform_0, window_bounds = array<i64: 8, 196>}, {pipeline_mode = #tpu.pipeline_mode<synchronous>, transform_indices = @transform_1, window_bounds = array<i64: 4, 196, 144>}, {pipeline_mode = #tpu.pipeline_mode<synchronous>, transform_indices = @transform_2, window_bounds = array<i64: 1, 144>}, {pipeline_mode = #tpu.pipeline_mode<synchronous>, transform_indices = @transform_3, window_bounds = array<i64: 4, 144, 32>}, {pipeline_mode = #tpu.pipeline_mode<synchronous>, transform_indices = @transform_4, window_bounds = array<i64: 1, 32>}, {pipeline_mode = #tpu.pipeline_mode<synchronous>, transform_indices = @transform_5, window_bounds = array<i64: 32, 32>}, {pipeline_mode = #tpu.pipeline_mode<synchronous>, transform_indices = @transform_6, window_bounds = array<i64: 1, 32>}, {pipeline_mode = #tpu.pipeline_mode<synchronous>, transform_indices = @transform_7, window_bounds = array<i64: 32, 50>}, {pipeline_mode = #tpu.pipeline_mode<synchronous>, transform_indices = @transform_8, window_bounds = array<i64: 1, 50>}, {pipeline_mode = #tpu.pipeline_mode<synchronous>, transform_indices = @transform_9, window_bounds = array<i64: 50, 10>}, {pipeline_mode = #tpu.pipeline_mode<synchronous>, transform_indices = @transform_10, window_bounds = array<i64: 1, 10>}, {transform_indices = @transform_11, window_bounds = array<i64: 8, 10>}]} {
    %c0 = arith.constant 0 : index
    %c0_0 = arith.constant 0 : index
    %0 = vector.load %arg1[%c0, %c0_0] : memref<8x196xbf16, #tpu.memory_space<vmem>>, vector<8x196xbf16>
    %c0_1 = arith.constant 0 : index
    %c0_2 = arith.constant 0 : index
    %c0_3 = arith.constant 0 : index
    %1 = vector.load %arg2[%c0_1, %c0_2, %c0_3] : memref<4x196x144xbf16, #tpu.memory_space<vmem>>, vector<1x196x144xbf16>
    %2 = vector.shape_cast %1 : vector<1x196x144xbf16> to vector<196x144xbf16>
    %cst = arith.constant dense<0.000000e+00> : vector<8x144xf32>
    %3 = tpu.matmul %0, %2, %cst {dimension_numbers = #tpu.dot_dimension_numbers<[1], [0], [0], [1], [0, 0, 1, 1], [], []>} : vector<8x196xbf16>, vector<196x144xbf16>, vector<8x144xf32> -> vector<8x144xf32>
    %c1 = arith.constant 1 : index
    %c0_4 = arith.constant 0 : index
    %c0_5 = arith.constant 0 : index
    %4 = vector.load %arg2[%c1, %c0_4, %c0_5] : memref<4x196x144xbf16, #tpu.memory_space<vmem>>, vector<1x196x144xbf16>
    %5 = vector.shape_cast %4 : vector<1x196x144xbf16> to vector<196x144xbf16>
    %cst_6 = arith.constant dense<0.000000e+00> : vector<8x144xf32>
    %6 = tpu.matmul %0, %5, %cst_6 {dimension_numbers = #tpu.dot_dimension_numbers<[1], [0], [0], [1], [0, 0, 1, 1], [], []>} : vector<8x196xbf16>, vector<196x144xbf16>, vector<8x144xf32> -> vector<8x144xf32>
    %7 = arith.maximumf %3, %6 : vector<8x144xf32>
    %c2 = arith.constant 2 : index
    %c0_7 = arith.constant 0 : index
    %c0_8 = arith.constant 0 : index
    %8 = vector.load %arg2[%c2, %c0_7, %c0_8] : memref<4x196x144xbf16, #tpu.memory_space<vmem>>, vector<1x196x144xbf16>
    %9 = vector.shape_cast %8 : vector<1x196x144xbf16> to vector<196x144xbf16>
    %cst_9 = arith.constant dense<0.000000e+00> : vector<8x144xf32>
    %10 = tpu.matmul %0, %9, %cst_9 {dimension_numbers = #tpu.dot_dimension_numbers<[1], [0], [0], [1], [0, 0, 1, 1], [], []>} : vector<8x196xbf16>, vector<196x144xbf16>, vector<8x144xf32> -> vector<8x144xf32>
    %11 = arith.maximumf %7, %10 : vector<8x144xf32>
    %c3 = arith.constant 3 : index
    %c0_10 = arith.constant 0 : index
    %c0_11 = arith.constant 0 : index
    %12 = vector.load %arg2[%c3, %c0_10, %c0_11] : memref<4x196x144xbf16, #tpu.memory_space<vmem>>, vector<1x196x144xbf16>
    %13 = vector.shape_cast %12 : vector<1x196x144xbf16> to vector<196x144xbf16>
    %cst_12 = arith.constant dense<0.000000e+00> : vector<8x144xf32>
    %14 = tpu.matmul %0, %13, %cst_12 {dimension_numbers = #tpu.dot_dimension_numbers<[1], [0], [0], [1], [0, 0, 1, 1], [], []>} : vector<8x196xbf16>, vector<196x144xbf16>, vector<8x144xf32> -> vector<8x144xf32>
    %15 = arith.maximumf %11, %14 : vector<8x144xf32>
    %c0_13 = arith.constant 0 : index
    %c0_14 = arith.constant 0 : index
    %16 = vector.load %arg3[%c0_13, %c0_14] : memref<1x144xf32, #tpu.memory_space<vmem>>, vector<1x144xf32>
    %17 = vector.broadcast %16 : vector<1x144xf32> to vector<8x144xf32>
    %18 = arith.addf %15, %17 : vector<8x144xf32>
    %cst_15 = arith.constant 0.000000e+00 : f32
    %19 = vector.broadcast %cst_15 : f32 to vector<8x144xf32>
    %20 = arith.maximumf %18, %19 : vector<8x144xf32>
    %21 = arith.truncf %20 : vector<8x144xf32> to vector<8x144xbf16>
    %c0_16 = arith.constant 0 : index
    %c0_17 = arith.constant 0 : index
    %c0_18 = arith.constant 0 : index
    %22 = vector.load %arg4[%c0_16, %c0_17, %c0_18] : memref<4x144x32xbf16, #tpu.memory_space<vmem>>, vector<1x144x32xbf16>
    %23 = vector.shape_cast %22 : vector<1x144x32xbf16> to vector<144x32xbf16>
    %cst_19 = arith.constant dense<0.000000e+00> : vector<8x32xf32>
    %24 = tpu.matmul %21, %23, %cst_19 {dimension_numbers = #tpu.dot_dimension_numbers<[1], [0], [0], [1], [0, 0, 1, 1], [], []>} : vector<8x144xbf16>, vector<144x32xbf16>, vector<8x32xf32> -> vector<8x32xf32>
    %c1_20 = arith.constant 1 : index
    %c0_21 = arith.constant 0 : index
    %c0_22 = arith.constant 0 : index
    %25 = vector.load %arg4[%c1_20, %c0_21, %c0_22] : memref<4x144x32xbf16, #tpu.memory_space<vmem>>, vector<1x144x32xbf16>
    %26 = vector.shape_cast %25 : vector<1x144x32xbf16> to vector<144x32xbf16>
    %cst_23 = arith.constant dense<0.000000e+00> : vector<8x32xf32>
    %27 = tpu.matmul %21, %26, %cst_23 {dimension_numbers = #tpu.dot_dimension_numbers<[1], [0], [0], [1], [0, 0, 1, 1], [], []>} : vector<8x144xbf16>, vector<144x32xbf16>, vector<8x32xf32> -> vector<8x32xf32>
    %28 = arith.maximumf %24, %27 : vector<8x32xf32>
    %c2_24 = arith.constant 2 : index
    %c0_25 = arith.constant 0 : index
    %c0_26 = arith.constant 0 : index
    %29 = vector.load %arg4[%c2_24, %c0_25, %c0_26] : memref<4x144x32xbf16, #tpu.memory_space<vmem>>, vector<1x144x32xbf16>
    %30 = vector.shape_cast %29 : vector<1x144x32xbf16> to vector<144x32xbf16>
    %cst_27 = arith.constant dense<0.000000e+00> : vector<8x32xf32>
    %31 = tpu.matmul %21, %30, %cst_27 {dimension_numbers = #tpu.dot_dimension_numbers<[1], [0], [0], [1], [0, 0, 1, 1], [], []>} : vector<8x144xbf16>, vector<144x32xbf16>, vector<8x32xf32> -> vector<8x32xf32>
    %32 = arith.maximumf %28, %31 : vector<8x32xf32>
    %c3_28 = arith.constant 3 : index
    %c0_29 = arith.constant 0 : index
    %c0_30 = arith.constant 0 : index
    %33 = vector.load %arg4[%c3_28, %c0_29, %c0_30] : memref<4x144x32xbf16, #tpu.memory_space<vmem>>, vector<1x144x32xbf16>
    %34 = vector.shape_cast %33 : vector<1x144x32xbf16> to vector<144x32xbf16>
    %cst_31 = arith.constant dense<0.000000e+00> : vector<8x32xf32>
    %35 = tpu.matmul %21, %34, %cst_31 {dimension_numbers = #tpu.dot_dimension_numbers<[1], [0], [0], [1], [0, 0, 1, 1], [], []>} : vector<8x144xbf16>, vector<144x32xbf16>, vector<8x32xf32> -> vector<8x32xf32>
    %36 = arith.maximumf %32, %35 : vector<8x32xf32>
    %c0_32 = arith.constant 0 : index
    %c0_33 = arith.constant 0 : index
    %37 = vector.load %arg5[%c0_32, %c0_33] : memref<1x32xf32, #tpu.memory_space<vmem>>, vector<1x32xf32>
    %38 = vector.broadcast %37 : vector<1x32xf32> to vector<8x32xf32>
    %39 = arith.addf %36, %38 : vector<8x32xf32>
    %cst_34 = arith.constant 0.000000e+00 : f32
    %40 = vector.broadcast %cst_34 : f32 to vector<8x32xf32>
    %41 = arith.maximumf %39, %40 : vector<8x32xf32>
    %42 = arith.truncf %41 : vector<8x32xf32> to vector<8x32xbf16>
    %c0_35 = arith.constant 0 : index
    %c0_36 = arith.constant 0 : index
    %43 = vector.load %arg6[%c0_35, %c0_36] : memref<32x32xbf16, #tpu.memory_space<vmem>>, vector<32x32xbf16>
    %cst_37 = arith.constant dense<0.000000e+00> : vector<8x32xf32>
    %44 = tpu.matmul %42, %43, %cst_37 {dimension_numbers = #tpu.dot_dimension_numbers<[1], [0], [0], [1], [0, 0, 1, 1], [], []>} : vector<8x32xbf16>, vector<32x32xbf16>, vector<8x32xf32> -> vector<8x32xf32>
    %c0_38 = arith.constant 0 : index
    %c0_39 = arith.constant 0 : index
    %45 = vector.load %arg7[%c0_38, %c0_39] : memref<1x32xf32, #tpu.memory_space<vmem>>, vector<1x32xf32>
    %46 = vector.broadcast %45 : vector<1x32xf32> to vector<8x32xf32>
    %47 = arith.addf %44, %46 : vector<8x32xf32>
    %cst_40 = arith.constant 0.000000e+00 : f32
    %48 = vector.broadcast %cst_40 : f32 to vector<8x32xf32>
    %49 = arith.maximumf %47, %48 : vector<8x32xf32>
    %50 = arith.truncf %49 : vector<8x32xf32> to vector<8x32xbf16>
    %c0_41 = arith.constant 0 : index
    %c0_42 = arith.constant 0 : index
    %51 = vector.load %arg8[%c0_41, %c0_42] : memref<32x50xbf16, #tpu.memory_space<vmem>>, vector<32x50xbf16>
    %cst_43 = arith.constant dense<0.000000e+00> : vector<8x50xf32>
    %52 = tpu.matmul %50, %51, %cst_43 {dimension_numbers = #tpu.dot_dimension_numbers<[1], [0], [0], [1], [0, 0, 1, 1], [], []>} : vector<8x32xbf16>, vector<32x50xbf16>, vector<8x50xf32> -> vector<8x50xf32>
    %c0_44 = arith.constant 0 : index
    %c0_45 = arith.constant 0 : index
    %53 = vector.load %arg9[%c0_44, %c0_45] : memref<1x50xf32, #tpu.memory_space<vmem>>, vector<1x50xf32>
    %54 = vector.broadcast %53 : vector<1x50xf32> to vector<8x50xf32>
    %55 = arith.addf %52, %54 : vector<8x50xf32>
    %cst_46 = arith.constant 0.000000e+00 : f32
    %56 = vector.broadcast %cst_46 : f32 to vector<8x50xf32>
    %57 = arith.maximumf %55, %56 : vector<8x50xf32>
    %58 = arith.truncf %57 : vector<8x50xf32> to vector<8x50xbf16>
    %c0_47 = arith.constant 0 : index
    %c0_48 = arith.constant 0 : index
    %59 = vector.load %arg10[%c0_47, %c0_48] : memref<50x10xbf16, #tpu.memory_space<vmem>>, vector<50x10xbf16>
    %cst_49 = arith.constant dense<0.000000e+00> : vector<8x10xf32>
    %60 = tpu.matmul %58, %59, %cst_49 {dimension_numbers = #tpu.dot_dimension_numbers<[1], [0], [0], [1], [0, 0, 1, 1], [], []>} : vector<8x50xbf16>, vector<50x10xbf16>, vector<8x10xf32> -> vector<8x10xf32>
    %c0_50 = arith.constant 0 : index
    %c0_51 = arith.constant 0 : index
    %61 = vector.load %arg11[%c0_50, %c0_51] : memref<1x10xf32, #tpu.memory_space<vmem>>, vector<1x10xf32>
    %62 = vector.broadcast %61 : vector<1x10xf32> to vector<8x10xf32>
    %63 = arith.addf %60, %62 : vector<8x10xf32>
    %cst_52 = arith.constant dense<0xFF800000> : vector<8xf32>
    %64 = vector.multi_reduction <maximumf>, %63, %cst_52 [1] : vector<8x10xf32> to vector<8xf32>
    %65 = vector.shape_cast %64 : vector<8xf32> to vector<8x1xf32>
    %66 = vector.broadcast %65 : vector<8x1xf32> to vector<8x10xf32>
    %67 = arith.subf %63, %66 : vector<8x10xf32>
    %68 = math.exp %67 : vector<8x10xf32>
    %cst_53 = arith.constant dense<0.000000e+00> : vector<8xf32>
    %69 = vector.multi_reduction <add>, %68, %cst_53 [1] : vector<8x10xf32> to vector<8xf32>
    %70 = vector.shape_cast %69 : vector<8xf32> to vector<8x1xf32>
    %71 = math.log %70 : vector<8x1xf32>
    %72 = vector.broadcast %71 : vector<8x1xf32> to vector<8x10xf32>
    %73 = arith.subf %67, %72 : vector<8x10xf32>
    %c0_54 = arith.constant 0 : index
    %c0_55 = arith.constant 0 : index
    %74 = vector.load %arg12[%c0_54, %c0_55] : memref<8x10xf32, #tpu.memory_space<vmem>>, vector<8x10xf32>
    tpu.vector_store %arg12[%c0_54, %c0_55], %73 {strides = array<i32>} : memref<8x10xf32, #tpu.memory_space<vmem>>, vector<8x10xf32>,
    return
  }
  func.func @transform_0(%arg0: i32) -> (i32, i32) {
    %c0_i32 = arith.constant 0 : i32
    %c0_i32_0 = arith.constant 0 : i32
    return %arg0, %c0_i32 : i32, i32
  }
  func.func @transform_1(%arg0: i32) -> (i32, i32, i32) {
    %c0_i32 = arith.constant 0 : i32
    %c0_i32_0 = arith.constant 0 : i32
    %c0_i32_1 = arith.constant 0 : i32
    %c0_i32_2 = arith.constant 0 : i32
    return %c0_i32, %c0_i32_0, %c0_i32_1 : i32, i32, i32
  }
  func.func @transform_2(%arg0: i32) -> (i32, i32) {
    %c0_i32 = arith.constant 0 : i32
    %c0_i32_0 = arith.constant 0 : i32
    %c0_i32_1 = arith.constant 0 : i32
    return %c0_i32, %c0_i32_0 : i32, i32
  }
  func.func @transform_3(%arg0: i32) -> (i32, i32, i32) {
    %c0_i32 = arith.constant 0 : i32
    %c0_i32_0 = arith.constant 0 : i32
    %c0_i32_1 = arith.constant 0 : i32
    %c0_i32_2 = arith.constant 0 : i32
    return %c0_i32, %c0_i32_0, %c0_i32_1 : i32, i32, i32
  }
  func.func @transform_4(%arg0: i32) -> (i32, i32) {
    %c0_i32 = arith.constant 0 : i32
    %c0_i32_0 = arith.constant 0 : i32
    %c0_i32_1 = arith.constant 0 : i32
    return %c0_i32, %c0_i32_0 : i32, i32
  }
  func.func @transform_5(%arg0: i32) -> (i32, i32) {
    %c0_i32 = arith.constant 0 : i32
    %c0_i32_0 = arith.constant 0 : i32
    %c0_i32_1 = arith.constant 0 : i32
    return %c0_i32, %c0_i32_0 : i32, i32
  }
  func.func @transform_6(%arg0: i32) -> (i32, i32) {
    %c0_i32 = arith.constant 0 : i32
    %c0_i32_0 = arith.constant 0 : i32
    %c0_i32_1 = arith.constant 0 : i32
    return %c0_i32, %c0_i32_0 : i32, i32
  }
  func.func @transform_7(%arg0: i32) -> (i32, i32) {
    %c0_i32 = arith.constant 0 : i32
    %c0_i32_0 = arith.constant 0 : i32
    %c0_i32_1 = arith.constant 0 : i32
    return %c0_i32, %c0_i32_0 : i32, i32
  }
  func.func @transform_8(%arg0: i32) -> (i32, i32) {
    %c0_i32 = arith.constant 0 : i32
    %c0_i32_0 = arith.constant 0 : i32
    %c0_i32_1 = arith.constant 0 : i32
    return %c0_i32, %c0_i32_0 : i32, i32
  }
  func.func @transform_9(%arg0: i32) -> (i32, i32) {
    %c0_i32 = arith.constant 0 : i32
    %c0_i32_0 = arith.constant 0 : i32
    %c0_i32_1 = arith.constant 0 : i32
    return %c0_i32, %c0_i32_0 : i32, i32
  }
  func.func @transform_10(%arg0: i32) -> (i32, i32) {
    %c0_i32 = arith.constant 0 : i32
    %c0_i32_0 = arith.constant 0 : i32
    %c0_i32_1 = arith.constant 0 : i32
    return %c0_i32, %c0_i32_0 : i32, i32
  }
  func.func @transform_11(%arg0: i32) -> (i32, i32) {
    %c0_i32 = arith.constant 0 : i32
    %c0_i32_0 = arith.constant 0 : i32
    return %arg0, %c0_i32 : i32, i32
  }
}

</mosaic_0001>

<bundles_post_ra>
// kernel: _forward_impl.1
= control target key start
LH: loop header
LB: loop body
LE: loop exit
PB: predicated region body
PF: predicated region fallthrough
CT: control target
= control target key end

     0   :  { %s3303_s0 = inlined_call_operand.vmem [shape: bf16[16,196], index: 0, kind: input, shape index: {}]   ;;  %s3304_s1 = inlined_call_operand.vmem [shape: bf16[4,196,144], index: 1, kind: input, shape index: {}]   ;;  %s3305_s2 = inlined_call_operand.vmem [shape: f32[1,144], index: 2, kind: input, shape index: {}]   ;;  %s3306_s3 = inlined_call_operand.vmem [shape: bf16[4,144,32], index: 3, kind: input, shape index: {}]   ;;  %s3307_s4 = inlined_call_operand.vmem [shape: f32[1,32], index: 4, kind: input, shape index: {}]   ;;  %s3308_s5 = inlined_call_operand.vmem [shape: bf16[32,32], index: 5, kind: input, shape index: {}]   ;;  %s3309_s6 = inlined_call_operand.vmem [shape: f32[1,32], index: 6, kind: input, shape index: {}]   ;;  %s3310_s7 = inlined_call_operand.vmem [shape: bf16[32,50], index: 7, kind: input, shape index: {}]   ;;  %s3311_s8 = inlined_call_operand.vmem [shape: f32[1,50], index: 8, kind: input, shape index: {}]   ;;  %s3312_s9 = inlined_call_operand.vmem [shape: bf16[50,10], index: 9, kind: input, shape index: {}]   ;;  %s3313_s10 = inlined_call_operand.vmem [shape: f32[1,10], index: 10, kind: input, shape index: {}]   ;;  %s3314_s11 = inlined_call_operand.hbm [shape: f32[16,10], index: 11, kind: output, shape index: {}]  }
   0x1   :  { %3315 = sst [smem:[#allocation6_spill]] %s3303_s0 }
   0x2   :  { %16 = vsyncpa [#allocation3], 0 }
   0x3   :  { %18 = vsyncpa [#allocation3 + $0x1], 0  ;;  %s2707_s17 = smov 0   ;;  %s2709_s18 = smov 0  }
   0x4   :  { %s2711_s19 = smov 0   ;;  %s2713_s20 = smov 0  }
   0x5 LB: > { %s2728_s21 = sadd.s32 4294967295, %s2641_s20   ;;  %s1988_s22 = sadd.s32 4294967294, %s2641_s20   ;;  %s2641_s20 = sphi %s2713_s20, %s3324_s20   ;;  %s2637_s19 = sphi %s2711_s19, %s3323_s19   ;;  %s2633_s18 = sphi %s2709_s18, %s3322_s18   ;;  %s2629_s17 = sphi %s2707_s17, %s3321_s17  }
   0x6   : > { %s2732_s23 = sadd.s32 1, %s2641_s20   ;;  %s267_s24 = sadd.s32 1, %s2637_s19 }
   0x7   : > { %s264_s25 = ssub.s32 %s2641_s20, %s2732_s23  ;;  %p277_p0 = scmp.ne.s32.totalorder %s2637_s19, %s2633_s18 }
   0x8   : > { %p265_p1 = scmp.eq.s32.totalorder %s264_s25, 0  ;;  %p278_p2 = scmp.eq.s32.totalorder %s2728_s21, 1 }
   0x9   : > { %p283_p3 = scmp.ne.s32.totalorder %s2633_s18, %s2629_s17  ;;  %p284_p4 = scmp.eq.s32.totalorder %s1988_s22, 1 }
   0xa   : > { %s2743_s26 = scalar_select %p265_p1, %s2637_s19, %s267_s24  }
   0xb   : > { %p2745_p5 = por %p278_p2, %p277_p0  ;;  %p2749_p6 = por %p284_p4, %p283_p3 }
   0xc   : > { %3316 = sst [smem:[#allocation5_spill]] %s2743_s26  ;;  %p1991_p7 = scmp.ge.s32.totalorder %s2641_s20, 1 }
   0xd   : > { %p340_p8 = scmp.lt.s32.totalorder %s2641_s20, 3 }
   0xf   : > { %p341_p9 = pnand %p1991_p7, %p340_p8 }
  0x10   : > { %p380_p10 = scmp.lt.s32.totalorder (!%p341_p9), %s2728_s21, 1  ;;  %s3319_s0 = sld [smem:[#allocation6_spill]] (!%p341_p9) }
  0x11   : > { %344 = sbr.rel (%p341_p9) target bundleno = 1492 (0x5d4), region = 64  ;;  %s2294_s12 = sshll.u32 (!%p341_p9), %s2728_s21, 7 }
  0x12   : > { %s1927_s22 = scalar_lea.hbm (!%p341_p9), %s3314_s11, %s2294_s12  ;;  %s2646_s29 = smov (!%p341_p9), [#allocation2]  }
  0x16   : > { %v2379_v0 = vld [vmem:[%s3304_s1 + $0x74] ss:$8 sps:$4 sm:$0xff]   ;;  %v2383_v2 = vld [vmem:[%s3304_s1 + $0x70] ss:$8 sps:$4 sm:$0xff]   ;;  %v2385_v4 = vld [vmem:[%s3304_s1 + $0x64] ss:$8 sps:$4 sm:$0xff]  }
  0x17   : > { %v2381_v1 = vld [vmem:[%s3304_s1 + $0x13c] ss:$8 sps:$4 sm:$0xff]   ;;  %554 = vmatprep.subr.bf16.mxu0 %v2379_v0  ;;  %v2384_v3 = vld [vmem:[%s3304_s1 + $0x138] ss:$8 sps:$4 sm:$0xff]   ;;  %v2387_v5 = vld [vmem:[%s3304_s1 + $0x12c] ss:$8 sps:$4 sm:$0xff]  }
  0x18   : > { %752 = vmatprep.subr.bf16.mxu1 %v2381_v1  ;;  %555 = vmatpush1.bf16.msra.mxu0 %v2383_v2  ;;  %v2389_v6 = vld [vmem:[%s3304_s1 + $0x60] ss:$8 sps:$4 sm:$0xff]   ;;  %v2391_v8 = vld [vmem:[%s3304_s1 + $0x54] ss:$8 sps:$4 sm:$0xff]   ;;  %v2395_v10 = vld [vmem:[%s3304_s1 + $0x50] ss:$8 sps:$4 sm:$0xff]  }
  0x19   : > { %753 = vmatpush1.bf16.msra.mxu1 %v2384_v3  ;;  %556 = vmatprep.subr.bf16.mxu0 %v2385_v4  ;;  %v2390_v7 = vld [vmem:[%s3304_s1 + $0x128] ss:$8 sps:$4 sm:$0xff]   ;;  %v2393_v9 = vld [vmem:[%s3304_s1 + $0x11c] ss:$8 sps:$4 sm:$0xff]   ;;  %v2396_v11 = vld [vmem:[%s3304_s1 + $0x118] ss:$8 sps:$4 sm:$0xff]  }
  0x1a   : > { %754 = vmatprep.subr.bf16.mxu1 %v2387_v5  ;;  %v2397_v12 = vld [vmem:[%s3304_s1 + $0x44] ss:$8 sps:$4 sm:$0xff]   ;;  %v2401_v14 = vld [vmem:[%s3304_s1 + $0x40] ss:$8 sps:$4 sm:$0xff]   ;;  %v2403_v16 = vld [vmem:[%s3304_s1 + $0x34] ss:$8 sps:$4 sm:$0xff]  }
  0x1b   : > { %v2399_v13 = vld [vmem:[%s3304_s1 + $0x10c] ss:$8 sps:$4 sm:$0xff]   ;;  %v2402_v15 = vld [vmem:[%s3304_s1 + $0x108] ss:$8 sps:$4 sm:$0xff]   ;;  %v2405_v17 = vld [vmem:[%s3304_s1 + $0xfc] ss:$8 sps:$4 sm:$0xff]  }
  0x1c   : > { %557 = vmatpush1.bf16.msra.mxu0 %v2389_v6  ;;  %v2407_v18 = vld [vmem:[%s3304_s1 + $0x30] ss:$8 sps:$4 sm:$0xff]   ;;  %v2409_v20 = vld [vmem:[%s3304_s1 + $0x24] ss:$8 sps:$4 sm:$0xff]   ;;  %v2413_v22 = vld [vmem:[%s3304_s1 + $0x20] ss:$8 sps:$4 sm:$0xff]  }
  0x1d   : > { %755 = vmatpush1.bf16.msra.mxu1 %v2390_v7  ;;  %558 = vmatprep.subr.bf16.mxu0 %v2391_v8  ;;  %v2408_v19 = vld [vmem:[%s3304_s1 + $0xf8] ss:$8 sps:$4 sm:$0xff]   ;;  %v2411_v21 = vld [vmem:[%s3304_s1 + $0xec] ss:$8 sps:$4 sm:$0xff]   ;;  %v2414_v23 = vld [vmem:[%s3304_s1 + $0xe8] ss:$8 sps:$4 sm:$0xff]  }
  0x1e   : > { %756 = vmatprep.subr.bf16.mxu1 %v2393_v9  ;;  %v2415_v24 = vld [vmem:[%s3304_s1 + $0x14] ss:$8 sps:$4 sm:$0xff]   ;;  %v2419_v26 = vld [vmem:[%s3304_s1 + $0x10] ss:$8 sps:$4 sm:$0xff]   ;;  %s381_s14 = scalar_select %p380_p10, %s2728_s21, 1  ;;  %vm547_vm0 = vcmask 1041408  }
  0x1f   : > { %v2417_v25 = vld [vmem:[%s3304_s1 + $0xdc] ss:$8 sps:$4 sm:$0xff]   ;;  %v2420_v27 = vld [vmem:[%s3304_s1 + $0xd8] ss:$8 sps:$4 sm:$0xff]   ;;  %v2423_v29 = vld [vmem:[%s3304_s1 + $0xcc] ss:$8 sps:$4 sm:$0xff]  }
  0x20   : > { %559 = vmatpush1.bf16.msra.mxu0 %v2395_v10  ;;  %v2421_v28 = vld [vmem:[%s3304_s1 + $0x4] ss:$8 sps:$4 sm:$0xff]   ;;  %v2425_v32 = vld [vmem:[%s3304_s1] ss:$8 sps:$4 sm:$0xff]   ;;  %s2297_s26 = sshll.u32 %s381_s14, 3  ;;  %vm543_vm1 = vcmask 556032  }
  0x21   : > { %757 = vmatpush1.bf16.msra.mxu1 %v2396_v11  ;;  %560 = vmatprep.subr.bf16.mxu0 %v2397_v12  ;;  %v411_v30 = vld [vmem:[%s3304_s1 + $0xc0] sm:$0x33]  ;;  %v2049_v31 = vld [vmem:[%s3304_s1 + $0x188] sm:$0x33]  ;;  %s384_s30 = scalar_lea.vmem %s3319_s0, %s2297_s26  ;;  %v2431_v38 = vld [vmem:[%s3304_s1 + $0xb4] ss:$8 sps:$4 sm:$0xff]  }
  0x22   : > { %758 = vmatprep.subr.bf16.mxu1 %v2399_v13  ;;  %v2426_v33 = vld [vmem:[%s3304_s1 + $0xc8] ss:$8 sps:$4 sm:$0xff]   ;;  %v2022_v34 = vcombine.high %v411_v30, %v411_v30  ;;  %v2075_v35 = vcombine.high %v2049_v31, %v2049_v31  ;;  %v2021_v36 = vcombine.low %v411_v30, %v411_v30  ;;  %v2074_v37 = vcombine.low %v2049_v31, %v2049_v31  ;;  %v2433_v39 = vld [vmem:[%s3304_s1 + $0x17c] ss:$8 sps:$4 sm:$0xff]   ;;  %v2436_v45 = vld [vmem:[%s3304_s1 + $0x178] ss:$8 sps:$4 sm:$0xff]  }
  0x23   : > { %v386_v42 = vld [vmem:[%s384_s30] sm:$0xff]  ;;  %v2435_v44 = vld [vmem:[%s3304_s1 + $0xb0] ss:$8 sps:$4 sm:$0xff]   ;;  %v2439_v47 = vld [vmem:[%s3304_s1 + $0x16c] ss:$8 sps:$4 sm:$0xff]   ;;  %vm1285_vm2 = vcmask 130048  }
  0x24   : > { %561 = vmatpush1.bf16.msra.mxu0 %v2401_v14  ;;  %v549_v40 = vsel %vm547_vm0, %v2021_v36, 0  ;;  %v747_v41 = vsel %vm547_vm0, %v2074_v37, 0  ;;  %v1996_v43 = vcombine.high %v386_v42, %v386_v42  ;;  %v2437_v46 = vld [vmem:[%s3304_s1 + $0xa4] ss:$8 sps:$4 sm:$0xff]   ;;  %v2441_v48 = vld [vmem:[%s3304_s1 + $0xa0] ss:$8 sps:$4 sm:$0xff]   ;;  %v2922_v60 = vcombine.low %v386_v42, %v386_v42 }
  0x25   : > { %759 = vmatpush1.bf16.msra.mxu1 %v2402_v15  ;;  %562 = vmatprep.subr.bf16.mxu0 %v2403_v16  ;;  %v2442_v49 = vld [vmem:[%s3304_s1 + $0x168] ss:$8 sps:$4 sm:$0xff]   ;;  %v2443_v50 = vld [vmem:[%s3304_s1 + $0x94] ss:$8 sps:$4 sm:$0xff]   ;;  %v2448_v53 = vld [vmem:[%s3304_s1 + $0x158] ss:$8 sps:$4 sm:$0xff]  }
  0x26   : > { %760 = vmatprep.subr.bf16.mxu1 %v2405_v17  ;;  %2024 = vmatprep.mubr.msk.bf16.mxu0 %vm543_vm1, %v1996_v43  ;;  %v2445_v51 = vld [vmem:[%s3304_s1 + $0x15c] ss:$8 sps:$4 sm:$0xff]   ;;  %v2447_v52 = vld [vmem:[%s3304_s1 + $0x90] ss:$8 sps:$4 sm:$0xff]   ;;  %v2451_v55 = vld [vmem:[%s3304_s1 + $0x14c] ss:$8 sps:$4 sm:$0xff]  }
  0x27   : > { %2077 = vmatprep.mubr.msk.bf16.mxu1 %vm543_vm1, %v1996_v43  ;;  %v2449_v54 = vld [vmem:[%s3304_s1 + $0x84] ss:$8 sps:$4 sm:$0xff]   ;;  %v2453_v56 = vld [vmem:[%s3304_s1 + $0x80] ss:$8 sps:$4 sm:$0xff]   ;;  %v2465_v63 = vld [vmem:[%s3304_s1 + $0x1f4] ss:$8 sps:$4 sm:$0xff]  }
  0x28   : > { %563 = vmatpush1.bf16.msra.mxu0 %v2407_v18  ;;  %v2454_v57 = vld [vmem:[%s3304_s1 + $0x148] ss:$8 sps:$4 sm:$0xff]   ;;  %v2459_v58 = vld [vmem:[%s3304_s1 + $0x204] ss:$8 sps:$4 sm:$0xff]   ;;  %v2466_v2 = vld [vmem:[%s3304_s1 + $0x2b8] ss:$8 sps:$4 sm:$0xff]  }
  0x29   : > { %761 = vmatpush1.bf16.msra.mxu1 %v2408_v19  ;;  %564 = vmatprep.subr.bf16.mxu0 %v2409_v20  ;;  %v2462_v59 = vld [vmem:[%s3304_s1 + $0x2cc] ss:$8 sps:$4 sm:$0xff]   ;;  %v2457_v61 = vld [vmem:[%s3304_s1 + $0x200] ss:$8 sps:$4 sm:$0xff]   ;;  %v2468_v0 = vld [vmem:[%s3304_s1 + $0x2bc] ss:$8 sps:$4 sm:$0xff]  }
  0x2a   : > { %762 = vmatprep.subr.bf16.mxu1 %v2411_v21  ;;  %v2460_v62 = vld [vmem:[%s3304_s1 + $0x2c8] ss:$8 sps:$4 sm:$0xff]   ;;  %v2471_v3 = vld [vmem:[%s3304_s1 + $0x1e4] ss:$8 sps:$4 sm:$0xff]   ;;  %v2155_v6 = vld [vmem:[%s3304_s1 + $0x318] sm:$0x33] }
  0x2b   : > { %v2463_v1 = vld [vmem:[%s3304_s1 + $0x1f0] ss:$8 sps:$4 sm:$0xff]   ;;  %v2474_v4 = vld [vmem:[%s3304_s1 + $0x2ac] ss:$8 sps:$4 sm:$0xff]   ;;  %v2469_v7 = vld [vmem:[%s3304_s1 + $0x1e0] ss:$8 sps:$4 sm:$0xff]   ;;  %v2180_v12 = vcombine.low %v2155_v6, %v2155_v6 }
  0x2c   : > { %565 = vmatpush1.bf16.msra.mxu0 %v2413_v22  ;;  %v2102_v5 = vld [vmem:[%s3304_s1 + $0x250] sm:$0x33]  ;;  %v2480_v10 = vld [vmem:[%s3304_s1 + $0x29c] ss:$8 sps:$4 sm:$0xff]   ;;  %v2478_v14 = vld [vmem:[%s3304_s1 + $0x298] ss:$8 sps:$4 sm:$0xff]  }
  0x2d   : > { %763 = vmatpush1.bf16.msra.mxu1 %v2414_v23  ;;  %566 = vmatprep.subr.bf16.mxu0 %v2415_v24  ;;  %v2472_v8 = vld [vmem:[%s3304_s1 + $0x2a8] ss:$8 sps:$4 sm:$0xff]   ;;  %v2477_v9 = vld [vmem:[%s3304_s1 + $0x1d4] ss:$8 sps:$4 sm:$0xff]   ;;  %v2127_v11 = vcombine.low %v2102_v5, %v2102_v5  ;;  %v2483_v15 = vld [vmem:[%s3304_s1 + $0x1c4] ss:$8 sps:$4 sm:$0xff]  }
  0x2e   : > { %764 = vmatprep.subr.bf16.mxu1 %v2417_v25  ;;  %v2475_v13 = vld [vmem:[%s3304_s1 + $0x1d0] ss:$8 sps:$4 sm:$0xff]   ;;  %v2486_v16 = vld [vmem:[%s3304_s1 + $0x28c] ss:$8 sps:$4 sm:$0xff]   ;;  %v1147_v18 = vsel %vm547_vm0, %v2180_v12, 0  ;;  %vm2645_vm3 = vmmov 0  }
  0x2f   : > { %v947_v17 = vsel %vm547_vm0, %v2127_v11, 0  ;;  %v2481_v19 = vld [vmem:[%s3304_s1 + $0x1c0] ss:$8 sps:$4 sm:$0xff]   ;;  %v2489_v21 = vld [vmem:[%s3304_s1 + $0x1b4] ss:$8 sps:$4 sm:$0xff]   ;;  %vm1704_vm4 = vcmask 261120  }
  0x30   : > { %567 = vmatpush1.bf16.msra.mxu0 %v2419_v26  ;;  %v2484_v20 = vld [vmem:[%s3304_s1 + $0x288] ss:$8 sps:$4 sm:$0xff]   ;;  %v2492_v22 = vld [vmem:[%s3304_s1 + $0x27c] ss:$8 sps:$4 sm:$0xff]   ;;  %v2490_v24 = vld [vmem:[%s3304_s1 + $0x278] ss:$8 sps:$4 sm:$0xff]  }
  0x31   : > { %765 = vmatpush1.bf16.msra.mxu1 %v2420_v27  ;;  %568 = vmatprep.subr.bf16.mxu0 %v2421_v28  ;;  %v2487_v23 = vld [vmem:[%s3304_s1 + $0x1b0] ss:$8 sps:$4 sm:$0xff]   ;;  %v2495_v25 = vld [vmem:[%s3304_s1 + $0x1a4] ss:$8 sps:$4 sm:$0xff]   ;;  %v2493_v27 = vld [vmem:[%s3304_s1 + $0x1a0] ss:$8 sps:$4 sm:$0xff]  }
  0x32   : > { %766 = vmatprep.subr.bf16.mxu1 %v2423_v29  ;;  %v2498_v26 = vld [vmem:[%s3304_s1 + $0x26c] ss:$8 sps:$4 sm:$0xff]   ;;  %v2496_v28 = vld [vmem:[%s3304_s1 + $0x268] ss:$8 sps:$4 sm:$0xff]   ;;  %v2504_v30 = vld [vmem:[%s3304_s1 + $0x25c] ss:$8 sps:$4 sm:$0xff]  }
  0x33   : > { %v2501_v29 = vld [vmem:[%s3304_s1 + $0x194] ss:$8 sps:$4 sm:$0xff]   ;;  %v2499_v31 = vld [vmem:[%s3304_s1 + $0x190] ss:$8 sps:$4 sm:$0xff]   ;;  %v2509_v37 = vld [vmem:[%s3304_s1 + $0x240] ss:$8 sps:$4 sm:$0xff]  }
  0x34   : > { %569 = vmatpush1.bf16.msra.mxu0 %v2425_v32  ;;  %v2502_v32 = vld [vmem:[%s3304_s1 + $0x258] ss:$8 sps:$4 sm:$0xff]   ;;  %v2514_v36 = vld [vmem:[%s3304_s1 + $0x30c] ss:$8 sps:$4 sm:$0xff]   ;;  %vm1857_vm5 = vcmask 1040384   ;;  %vm1853_vm6 = vcmask 408576  }
  0x35   : > { %767 = vmatpush1.bf16.msra.mxu1 %v2426_v33  ;;  %2023 = vmatprep.subr.msk.bf16.mxu0 %vm547_vm0, %v2022_v34  ;;  %v2128_v33 = vcombine.high %v2102_v5, %v2102_v5  ;;  %v2181_v34 = vcombine.high %v2155_v6, %v2155_v6  ;;  %v2518_v42 = vld [vmem:[%s3304_s1 + $0x2f8] ss:$8 sps:$4 sm:$0xff]   ;;  %v2550_v5 = vld [vmem:[%s3306_s3 + $0x88] sm:$0xff]   ;;  %vm1901_vm7 = vcmask 80896   ;;  %s377_s14 = sand.u32 1, %s2633_s18   ;;  %s2585_s0 = sshll.u32 %s2646_s29, 4  ;;  %s2586_s0 = int_to_ptr.vmem [resolvable:$false] %s2585_s0 }
  0x36   : > { %2076 = vmatprep.subr.msk.bf16.mxu1 %vm547_vm0, %v2075_v35  ;;  %v2511_v35 = vld [vmem:[%s3304_s1 + $0x244] ss:$8 sps:$4 sm:$0xff]   ;;  %s1992_s30 = sshll.u32 %s377_s14, 3  ;;  %s1916_s24 = scalar_lea.sflag [#allocation3], %s377_s14 }
  0x37   : > { %s379_s13 = scalar_lea.vmem [#allocation2], %s1992_s30  ;;  %s2587_s21 = scalar_lea.vmem %s2586_s0, 256 }
  0x38   : > { %577 = vmatpush2.bf16.msra.mxu0 %v549_v40  ;;  %v2520_v40 = vld [vmem:[%s3304_s1 + $0x2fc] ss:$8 sps:$4 sm:$0xff]   ;;  %s1929_s15 = sshll.u32 %s379_s13, 4  ;;  %s1930_s15 = int_to_ptr.vmem [resolvable:$true] %s1929_s15 }
  0x39   : > { %775 = vmatpush2.bf16.msra.mxu1 %v747_v41  ;;  %578 = vmatprep.subr.bf16.mxu0 %v2431_v38  ;;  %v2512_v38 = vld [vmem:[%s3304_s1 + $0x308] ss:$8 sps:$4 sm:$0xff]   ;;  %s2581_s25 = scalar_lea.vmem %s1930_s15, 128  ;;  %p2588_p0 = scmp.lt.s32.totalorder %s1930_s15, %s2586_s0 }
  0x3a   : > { %776 = vmatprep.subr.bf16.mxu1 %v2433_v39  ;;  %v2517_v39 = vld [vmem:[%s3304_s1 + $0x234] ss:$8 sps:$4 sm:$0xff]   ;;  %v2515_v41 = vld [vmem:[%s3304_s1 + $0x230] ss:$8 sps:$4 sm:$0xff]   ;;  %p2582_p11 = scmp.ne.s32.totalorder %s1930_s15, %s2581_s25  ;;  %p2589_p1 = scmp.lt.s32.totalorder %s2587_s21, %s2581_s25 }
  0x3c   : > { %579 = vmatpush2.bf16.msra.mxu0 %v2435_v44  ;;  %v2526_v44 = vld [vmem:[%s3304_s1 + $0x2ec] ss:$8 sps:$4 sm:$0xff]   ;;  %p2583_p12 = pnand %p2582_p11, %p2745_p5  ;;  %p2590_p2 = por %p2589_p1, %p2588_p0 }
  0x3d   : > { %777 = vmatpush2.bf16.msra.mxu1 %v2436_v45  ;;  %580 = vmatprep.subr.bf16.mxu0 %v2437_v46  ;;  %v2521_v45 = vld [vmem:[%s3304_s1 + $0x220] ss:$8 sps:$4 sm:$0xff]  }
  0x3e   : > { %778 = vmatprep.subr.bf16.mxu1 %v2439_v47  ;;  %v2524_v46 = vld [vmem:[%s3304_s1 + $0x2e8] ss:$8 sps:$4 sm:$0xff]   ;;  %v2529_v47 = vld [vmem:[%s3304_s1 + $0x214] ss:$8 sps:$4 sm:$0xff]   ;;  %p2584_p13 = pneg %p2583_p12 }
  0x40   : > { %581 = vmatpush2.bf16.msra.mxu0 %v2441_v48  ;;  %v2532_v48 = vld [vmem:[%s3304_s1 + $0x2dc] ss:$8 sps:$4 sm:$0xff]   ;;  %p2591_p3 = pnand %p2590_p2, %p2584_p13 }
  0x41   : > { %779 = vmatpush2.bf16.msra.mxu1 %v2442_v49  ;;  %582 = vmatprep.subr.bf16.mxu0 %v2443_v50  ;;  %v2527_v49 = vld [vmem:[%s3304_s1 + $0x210] ss:$8 sps:$4 sm:$0xff]  }
  0x42   : > { %780 = vmatprep.subr.bf16.mxu1 %v2445_v51  ;;  %v2530_v50 = vld [vmem:[%s3304_s1 + $0x2d8] ss:$8 sps:$4 sm:$0xff]  }
  0x43   : > { %v2533_v51 = vld [vmem:[%s3306_s3 + $0x38] sm:$0xff]  }
  0x44   : > { %583 = vmatpush2.bf16.msra.mxu0 %v2447_v52  ;;  %v2534_v52 = vld [vmem:[%s3306_s3 + $0x80] sm:$0xff]  }
  0x45   : > { %781 = vmatpush2.bf16.msra.mxu1 %v2448_v53  ;;  %584 = vmatprep.subr.bf16.mxu0 %v2449_v54  ;;  %v2643_v53 = vmov 0   ;;  %v2535_v54 = vld [vmem:[%s3306_s3 + $0x30] sm:$0xff]  }
  0x46   : > { %782 = vmatprep.subr.bf16.mxu1 %v2451_v55  ;;  %v2536_v55 = vld [vmem:[%s3306_s3 + $0x78] sm:$0xff]  }
  0x48   : > { %585 = vmatpush2.bf16.msra.mxu0 %v2453_v56  ;;  %v2537_v56 = vld [vmem:[%s3306_s3 + $0x28] sm:$0xff]  }
  0x49   : > { %783 = vmatpush2.bf16.msra.mxu1 %v2454_v57  ;;  %952 = vmatprep.subr.bf16.mxu0 %v2459_v58  ;;  %v2538_v57 = vld [vmem:[%s3306_s3 + $0x70] sm:$0xff]   ;;  %v2539_v58 = vld [vmem:[%s3306_s3 + $0x20] sm:$0xff]  }
  0x4a   : > { %1152 = vmatprep.subr.bf16.mxu1 %v2462_v59  ;;  %v2540_v59 = vld [vmem:[%s3306_s3 + $0x68] sm:$0xff]  }
  0x4b   : > { %587 = vmatmul.mubr.bf16.vlgmr.msra.gmra.mxu0 %v2922_v60 }
  0x4c   : > { %785 = vmatmul.mubr.bf16.vlgmr.msra.gmra.mxu1 %v2922_v60  ;;  %953 = vmatpush1.bf16.msra.mxu0 %v2457_v61  ;;  %v2542_v61 = vld [vmem:[%s3306_s3 + $0x60] sm:$0xff]  }
  0x4d   : > { %1153 = vmatpush1.bf16.msra.mxu1 %v2460_v62  ;;  %954 = vmatprep.subr.bf16.mxu0 %v2465_v63  ;;  %v2543_v62 = vld [vmem:[%s3306_s3 + $0x10] sm:$0xff]   ;;  %v2544_v63 = vld [vmem:[%s3306_s3 + $0x58] sm:$0xff]  }
  0x4e   : > { %1154 = vmatprep.subr.bf16.mxu1 %v2468_v0  ;;  %2130 = vmatprep.mubr.msk.bf16.mxu0 %vm543_vm1, %v1996_v43  ;;  %v2545_v0 = vld [vmem:[%s3306_s3 + $0x8] sm:$0xff]  }
  0x4f   : > { %2183 = vmatprep.mubr.msk.bf16.mxu1 %vm543_vm1, %v1996_v43  ;;  %v2523_v43 = vld [vmem:[%s3304_s1 + $0x224] ss:$8 sps:$4 sm:$0xff]  }
  0x50   : > { %955 = vmatpush1.bf16.msra.mxu0 %v2463_v1  ;;  %v2546_v1 = vld [vmem:[%s3306_s3 + $0x50] sm:$0xff]  }
  0x51   : > { %1155 = vmatpush1.bf16.msra.mxu1 %v2466_v2  ;;  %956 = vmatprep.subr.bf16.mxu0 %v2471_v3  ;;  %v2547_v2 = vld [vmem:[%s3306_s3] sm:$0xff]   ;;  %v2548_v3 = vld [vmem:[%s3306_s3 + $0x48] sm:$0xff]  }
  0x52   : > { %1156 = vmatprep.subr.bf16.mxu1 %v2474_v4  ;;  %v2549_v4 = vld [vmem:[%s3306_s3 + $0x40] sm:$0xff]  }
  0x54   : > { %957 = vmatpush1.bf16.msra.mxu0 %v2469_v7 }
  0x55   : > { %1157 = vmatpush1.bf16.msra.mxu1 %v2472_v8  ;;  %958 = vmatprep.subr.bf16.mxu0 %v2477_v9 }
  0x56   : > { %1158 = vmatprep.subr.bf16.mxu1 %v2480_v10 }
  0x58   : > { %959 = vmatpush1.bf16.msra.mxu0 %v2475_v13 }
  0x59   : > { %1159 = vmatpush1.bf16.msra.mxu1 %v2478_v14  ;;  %960 = vmatprep.subr.bf16.mxu0 %v2483_v15  ;;  %v1197_v14 = vlaneseq }
  0x5a   : > { %1160 = vmatprep.subr.bf16.mxu1 %v2486_v16 }
  0x5b   : > { %v1198_v15 = vshrl.u32 %v1197_v14, 7 }
  0x5c   : > { %961 = vmatpush1.bf16.msra.mxu0 %v2481_v19 }
  0x5d   : > { %1161 = vmatpush1.bf16.msra.mxu1 %v2484_v20  ;;  %962 = vmatprep.subr.bf16.mxu0 %v2489_v21  ;;  %v1199_v16 = vsub.s32 0, %v1198_v15  ;;  %v1203_v19 = vsub.s32 1, %v1198_v15 }
  0x5e   : > { %1162 = vmatprep.subr.bf16.mxu1 %v2492_v22 }
  0x60   : > { %963 = vmatpush1.bf16.msra.mxu0 %v2487_v23 }
  0x61   : > { %1163 = vmatpush1.bf16.msra.mxu1 %v2490_v24  ;;  %964 = vmatprep.subr.bf16.mxu0 %v2495_v25 }
  0x62   : > { %1164 = vmatprep.subr.bf16.mxu1 %v2498_v26 }
  0x64   : > { %965 = vmatpush1.bf16.msra.mxu0 %v2493_v27 }
  0x65   : > { %1165 = vmatpush1.bf16.msra.mxu1 %v2496_v28  ;;  %966 = vmatprep.subr.bf16.mxu0 %v2501_v29 }
  0x66   : > { %1166 = vmatprep.subr.bf16.mxu1 %v2504_v30 }
  0x68   : > { %967 = vmatpush1.bf16.msra.mxu0 %v2499_v31 }
  0x69   : > { %1167 = vmatpush1.bf16.msra.mxu1 %v2502_v32  ;;  %2129 = vmatprep.subr.msk.bf16.mxu0 %vm547_vm0, %v2128_v33 }
  0x6a   : > { %2182 = vmatprep.subr.msk.bf16.mxu1 %vm547_vm0, %v2181_v34 }
  0x6c   : > { %975 = vmatpush2.bf16.msra.mxu0 %v947_v17  ;;  %v1195_v17 = vld [vmem:[%s3305_s2] sm:$0x3] }
  0x6d   : > { %1175 = vmatpush2.bf16.msra.mxu1 %v1147_v18  ;;  %976 = vmatprep.subr.bf16.mxu0 %v2511_v35  ;;  %v1200_v24 = vrot.slane %v1195_v17, %v1199_v16  ;;  %v1204_v29 = vrot.slane %v1195_v17, %v1203_v19 }
  0x6e   : > { %1176 = vmatprep.subr.bf16.mxu1 %v2514_v36 }
  0x70   : > { %977 = vmatpush2.bf16.msra.mxu0 %v2509_v37 }
  0x71   : > { %1177 = vmatpush2.bf16.msra.mxu1 %v2512_v38  ;;  %978 = vmatprep.subr.bf16.mxu0 %v2517_v39 }
  0x72   : > { %1178 = vmatprep.subr.bf16.mxu1 %v2520_v40  ;;  %v2551_v40 = vld [vmem:[%s3306_s3 + $0xc8] sm:$0xff]  }
  0x74   : > { %979 = vmatpush2.bf16.msra.mxu0 %v2515_v41  ;;  %v2552_v41 = vld [vmem:[%s3306_s3 + $0x110] sm:$0xff]  }
  0x75   : > { %1179 = vmatpush2.bf16.msra.mxu1 %v2518_v42  ;;  %980 = vmatprep.subr.bf16.mxu0 %v2523_v43  ;;  %v2553_v43 = vld [vmem:[%s3306_s3 + $0xc0] sm:$0xff]  }
  0x76   : > { %1180 = vmatprep.subr.bf16.mxu1 %v2526_v44  ;;  %v2554_v44 = vld [vmem:[%s3306_s3 + $0x108] sm:$0xff]  }
  0x78   : > { %981 = vmatpush2.bf16.msra.mxu0 %v2521_v45  ;;  %v2555_v45 = vld [vmem:[%s3306_s3 + $0xb8] sm:$0xff]  }
  0x79   : > { %1181 = vmatpush2.bf16.msra.mxu1 %v2524_v46  ;;  %982 = vmatprep.subr.bf16.mxu0 %v2529_v47  ;;  %v2556_v46 = vld [vmem:[%s3306_s3 + $0x100] sm:$0xff]   ;;  %v2557_v47 = vld [vmem:[%s3306_s3 + $0xb0] sm:$0xff]  }
  0x7a   : > { %1182 = vmatprep.subr.bf16.mxu1 %v2532_v48  ;;  %v2558_v48 = vld [vmem:[%s3306_s3 + $0xf8] sm:$0xff]  }
  0x7c   : > { %983 = vmatpush2.bf16.msra.mxu0 %v2527_v49  ;;  %v2559_v49 = vld [vmem:[%s3306_s3 + $0xa8] sm:$0xff]  }
  0x7d   : > { %1183 = vmatpush2.bf16.msra.mxu1 %v2530_v50  ;;  %1289 = vmatprep.subr.bf16.mxu0 %v2643_v53  ;;  %v2560_v50 = vld [vmem:[%s3306_s3 + $0xf0] sm:$0xff]  }
  0x7e   : > { %1402 = vmatprep.subr.bf16.mxu1 %v2643_v53 }
  0x7f   : > { %985 = vmatmul.mubr.bf16.vlgmr.msra.gmra.mxu0 %v2922_v60 }
  0x80   : > { %1185 = vmatmul.mubr.bf16.vlgmr.msra.gmra.mxu1 %v2922_v60  ;;  %1290 = vmatpush1.bf16.msra.mxu0 %v2533_v51  ;;  %v2541_v60 = vld [vmem:[%s3306_s3 + $0x18] sm:$0xff]   ;;  %v2561_v51 = vld [vmem:[%s3306_s3 + $0xa0] sm:$0xff]  }
  0x81   : > { %1403 = vmatpush1.bf16.msra.mxu1 %v2534_v52  ;;  %1291 = vmatprep.subr.bf16.mxu0 %v2643_v53  ;;  %v2562_v52 = vld [vmem:[%s3306_s3 + $0xe8] sm:$0xff]  }
  0x82   : > { %1404 = vmatprep.subr.bf16.mxu1 %v2643_v53 }
  0x84   : > { %1292 = vmatpush1.bf16.msra.mxu0 %v2535_v54  ;;  %v2563_v54 = vld [vmem:[%s3306_s3 + $0x98] sm:$0xff]  }
  0x85   : > { %1405 = vmatpush1.bf16.msra.mxu1 %v2536_v55  ;;  %1293 = vmatprep.subr.bf16.mxu0 %v2643_v53  ;;  %v2564_v55 = vld [vmem:[%s3306_s3 + $0xe0] sm:$0xff]  }
  0x86   : > { %1406 = vmatprep.subr.bf16.mxu1 %v2643_v53 }
  0x88   : > { %1294 = vmatpush1.bf16.msra.mxu0 %v2537_v56  ;;  %v2565_v56 = vld [vmem:[%s3306_s3 + $0x90] sm:$0xff]  }
  0x89   : > { %1407 = vmatpush1.bf16.msra.mxu1 %v2538_v57  ;;  %1295 = vmatprep.subr.bf16.mxu0 %v2643_v53  ;;  %v2566_v57 = vld [vmem:[%s3306_s3 + $0xd8] sm:$0xff]  }
  0x8a   : > { %1408 = vmatprep.subr.bf16.mxu1 %v2643_v53 }
  0x8c   : > { %1296 = vmatpush1.bf16.msra.mxu0 %v2539_v58  ;;  %v2567_v58 = vld [vmem:[%s3306_s3 + $0xd0] sm:$0xff]  }
  0x8d   : > { %1409 = vmatpush1.bf16.msra.mxu1 %v2540_v59  ;;  %1297 = vmatprep.subr.bf16.mxu0 %v2643_v53  ;;  %v2568_v59 = vld [vmem:[%s3306_s3 + $0x118] sm:$0xff]  }
  0x8e   : > { %1410 = vmatprep.subr.bf16.mxu1 %v2643_v53 }
  0x90   : > { %1298 = vmatpush1.bf16.msra.mxu0 %v2541_v60  ;;  %v2569_v60 = vld [vmem:[%s3308_s5 + $0x8] sm:$0xff]  }
  0x91   : > { %1411 = vmatpush1.bf16.msra.mxu1 %v2542_v61  ;;  %1299 = vmatprep.subr.bf16.mxu0 %v2643_v53  ;;  %v2644_v61 = vmov 0.0  }
  0x92   : > { %1412 = vmatprep.subr.bf16.mxu1 %v2643_v53 }
  0x94   : > { %1300 = vmatpush1.bf16.msra.mxu0 %v2543_v62  ;;  %v2570_v62 = vld [vmem:[%s3308_s5] sm:$0xff]  }
  0x95   : > { %1413 = vmatpush1.bf16.msra.mxu1 %v2544_v63  ;;  %1301 = vmatprep.subr.bf16.mxu0 %v2643_v53 }
  0x96   : > { %1414 = vmatprep.subr.bf16.mxu1 %v2643_v53 }
  0x98   : > { %1302 = vmatpush1.bf16.msra.mxu0 %v2545_v0 }
  0x99   : > { %1415 = vmatpush1.bf16.msra.mxu1 %v2546_v1  ;;  %1303 = vmatprep.subr.bf16.mxu0 %v2643_v53 }
  0x9a   : > { %1416 = vmatprep.subr.bf16.mxu1 %v2643_v53 }
  0x9c   : > { %1304 = vmatpush1.bf16.msra.mxu0 %v2547_v2 }
  0x9d   : > { %1417 = vmatpush1.bf16.msra.mxu1 %v2548_v3  ;;  %1319 = vmatprep.subr.bf16.mxu0 %v2643_v53 }
  0x9e   : > { %1432 = vmatprep.subr.bf16.mxu1 %v2643_v53 }
  0xa0   : > { %1320 = vmatpush2.bf16.msra.mxu0 %v2549_v4 }
  0xa1   : > { %1433 = vmatpush2.bf16.msra.mxu1 %v2550_v5  ;;  %1516 = vmatprep.subr.bf16.mxu0 %v2643_v53 }
  0xa2   : > { %1630 = vmatprep.subr.bf16.mxu1 %v2643_v53 }
 0x10b   : > { %v588_v6 = vpop.f32.mrf.mxu0 }
 0x10c   : > { %v786_v7 = vpop.f32.mrf.mxu1 }
 0x10d   : > { %v590_v8 = vpop.f32.mrf.mxu0  ;;  %v793_v18 = vmax.f32 %v588_v6, %v786_v7 }
 0x10e   : > { %v788_v9 = vpop.f32.mrf.mxu1 }
 0x10f   : > { %v592_v10 = vpop.f32.mrf.mxu0  ;;  %v794_v22 = vmax.f32 %v590_v8, %v788_v9 }
 0x110   : > { %v790_v11 = vpop.f32.mrf.mxu1  ;;  %v2278_v10 = vld [vmem:[%s3307_s4] ss:$0 sm:$0xff] }
 0x111   : > { %v593_v12 = vpop.f32.mrf.mxu0 }
 0x112   : > { %v791_v13 = vpop.f32.mrf.mxu1 }
 0x13f   : > { %v986_v20 = vpop.f32.mrf.mxu0 }
 0x140   : > { %v1186_v21 = vpop.f32.mrf.mxu1  ;;  %v993_v23 = vmax.f32 %v793_v18, %v986_v20  ;;  %v2571_v20 = vld [vmem:[%s3310_s7 + $0x8] sm:$0xff]  }
 0x141   : > { %v988_v25 = vpop.f32.mrf.mxu0 }
 0x142   : > { %v1188_v26 = vpop.f32.mrf.mxu1  ;;  %v1193_v27 = vmax.f32 %v993_v23, %v1186_v21  ;;  %v994_v28 = vmax.f32 %v794_v22, %v988_v25  ;;  %v2572_v22 = vld [vmem:[%s3310_s7] sm:$0xff]   ;;  %v2573_v23 = vld [vmem:[%s3312_s9 + $0x18] ss:$0 sps:$4 sm:$0x11]   ;;  %v2574_v25 = vld [vmem:[%s3312_s9 + $0x10] sm:$0xff]  }
 0x143   : > { %v990_v30 = vpop.f32.mrf.mxu0 }
 0x144   : > { %v1190_v31 = vpop.f32.mrf.mxu1  ;;  %v1207_v32 = vadd.f32 %v1200_v24, %v1193_v27  ;;  %v1194_v33 = vmax.f32 %v994_v28, %v1188_v26  ;;  %v1859_v24 = vsel %vm1857_vm5, %v2573_v23, 0  ;;  %v2279_v26 = vld [vmem:[%s3309_s6] ss:$0 sm:$0xff] }
 0x145   : > { %v991_v34 = vpop.f32.mrf.mxu0 }
 0x146   : > { %v1191_v35 = vpop.f32.mrf.mxu1  ;;  %v1208_v36 = vadd.f32 %v1204_v29, %v1194_v33  ;;  %v1209_v37 = vmax.f32 %v1207_v32, 0.0  ;;  %v2575_v34 = vld [vmem:[%s3312_s9 + $0x8] sm:$0xff]  }
 0x147   : > { %v2576_v35 = vld [vmem:[%s3312_s9] sm:$0xff]  }
 0x148   : > { %v1210_v38 = vmax.f32 %v1208_v36, 0.0  ;;  %v1211_v42 = vpack.c.bf16 %v1209_v37, %v1209_v37  ;;  %v2283_v36 = vld [vmem:[%s3311_s8] ss:$0 sm:$0xff] }
 0x14a   : > { %v1212_v39 = vpack.c.bf16 %v1210_v38, %v1210_v38 }
 0x14c   : > { %2193 = vmatprep.mubr.msk.bf16.mxu0 %vm1285_vm2, %v1212_v39  ;;  %2221 = vmatprep.mubr.msk.bf16.mxu1 %vm1285_vm2, %v1212_v39 }
 0x14d   : > { %1322 = vmatmul.mubr.bf16.vlgmr.msra.gmra.mxu0 %v1211_v42  ;;  %1435 = vmatmul.mubr.bf16.vlgmr.msra.gmra.mxu1 %v1211_v42 }
 0x14e   : > { %1517 = vmatpush1.bf16.msra.mxu0 %v2551_v40  ;;  %1631 = vmatpush1.bf16.msra.mxu1 %v2552_v41 }
 0x14f   : > { %2249 = vmatprep.mubr.msk.bf16.mxu0 %vm1285_vm2, %v1212_v39  ;;  %2277 = vmatprep.mubr.msk.bf16.mxu1 %vm1285_vm2, %v1212_v39 }
 0x150   : > { %1518 = vmatprep.subr.bf16.mxu0 %v2643_v53  ;;  %1632 = vmatprep.subr.bf16.mxu1 %v2643_v53 }
 0x152   : > { %1519 = vmatpush1.bf16.msra.mxu0 %v2553_v43  ;;  %1633 = vmatpush1.bf16.msra.mxu1 %v2554_v44  ;;  %v2287_v44 = vld [vmem:[%s3313_s10] ss:$0 sm:$0xff] }
 0x153   : > { %1520 = vmatprep.subr.bf16.mxu0 %v2643_v53  ;;  %1634 = vmatprep.subr.bf16.mxu1 %v2643_v53 }
 0x156   : > { %1521 = vmatpush1.bf16.msra.mxu0 %v2555_v45  ;;  %1635 = vmatpush1.bf16.msra.mxu1 %v2556_v46 }
 0x157   : > { %1522 = vmatprep.subr.bf16.mxu0 %v2643_v53  ;;  %1636 = vmatprep.subr.bf16.mxu1 %v2643_v53 }
 0x15a   : > { %1523 = vmatpush1.bf16.msra.mxu0 %v2557_v47  ;;  %1637 = vmatpush1.bf16.msra.mxu1 %v2558_v48 }
 0x15b   : > { %1524 = vmatprep.subr.bf16.mxu0 %v2643_v53  ;;  %1638 = vmatprep.subr.bf16.mxu1 %v2643_v53 }
 0x15e   : > { %1525 = vmatpush1.bf16.msra.mxu0 %v2559_v49  ;;  %1639 = vmatpush1.bf16.msra.mxu1 %v2560_v50 }
 0x15f   : > { %1526 = vmatprep.subr.bf16.mxu0 %v2643_v53  ;;  %1640 = vmatprep.subr.bf16.mxu1 %v2643_v53 }
 0x162   : > { %1527 = vmatpush1.bf16.msra.mxu0 %v2561_v51  ;;  %1641 = vmatpush1.bf16.msra.mxu1 %v2562_v52 }
 0x163   : > { %1528 = vmatprep.subr.bf16.mxu0 %v2643_v53  ;;  %1642 = vmatprep.subr.bf16.mxu1 %v2643_v53 }
 0x166   : > { %1529 = vmatpush1.bf16.msra.mxu0 %v2563_v54  ;;  %1643 = vmatpush1.bf16.msra.mxu1 %v2564_v55 }
 0x167   : > { %1530 = vmatprep.subr.bf16.mxu0 %v2643_v53  ;;  %1644 = vmatprep.subr.bf16.mxu1 %v2643_v53 }
 0x16a   : > { %1531 = vmatpush1.bf16.msra.mxu0 %v2565_v56  ;;  %1645 = vmatpush1.bf16.msra.mxu1 %v2566_v57 }
 0x16b   : > { %1546 = vmatprep.subr.bf16.mxu0 %v2643_v53  ;;  %1660 = vmatprep.subr.bf16.mxu1 %v2643_v53 }
 0x16e   : > { %1547 = vmatpush2.bf16.msra.mxu0 %v2567_v58  ;;  %1661 = vmatpush2.bf16.msra.mxu1 %v2568_v59 }
 0x16f   : > { %2309 = vmatprep.subr.bf16.mxu1 %v2644_v61  ;;  %2325 = vmatprep.subr.bf16.mxu0 %v2644_v61 }
 0x171   : > { %1549 = vmatmul.mubr.bf16.vlgmr.msra.gmra.mxu0 %v1211_v42  ;;  %1663 = vmatmul.mubr.bf16.vlgmr.msra.gmra.mxu1 %v1211_v42 }
 0x172   : > { %2310 = vmatpush3.bf16.msra.mxu1 %v2569_v60  ;;  %2313 = vmatprep.mubr.msk.bf16.mxu1 %vm2645_vm3, %v2644_v61 }
 0x173   : > { %2311 = vmatprep.subr.bf16.mxu1 %v2644_v61  ;;  %2333 = vmatprep.mubr.msk.bf16.mxu0 %vm2645_vm3, %v2644_v61 }
 0x174   : > { %2326 = vmatpush3.bf16.msra.mxu0 %v1859_v24 }
 0x175   : > { %2327 = vmatprep.subr.bf16.mxu0 %v2644_v61 }
 0x176   : > { %2312 = vmatpush3.bf16.msra.mxu1 %v2570_v62 }
 0x177   : > { %2317 = vmatprep.subr.bf16.mxu1 %v2644_v61 }
 0x178   : > { %2328 = vmatpush3.bf16.msra.mxu0 %v2574_v25 }
 0x179   : > { %2329 = vmatprep.subr.bf16.mxu0 %v2644_v61 }
 0x17c   : > { %2330 = vmatpush3.bf16.msra.mxu0 %v2575_v34 }
 0x17d   : > { %2331 = vmatprep.subr.bf16.mxu0 %v2644_v61 }
 0x180   : > { %2332 = vmatpush3.bf16.msra.mxu0 %v2576_v35 }
 0x20d   : > { %v1323_v53 = vpop.f32.mrf.mxu0  ;;  %v1436_v63 = vpop.f32.mrf.mxu1 }
 0x20e   : > { %v1442_v6 = vmax.f32 %v1323_v53, %v1436_v63 }
 0x20f   : > { %v1325_v0 = vpop.f32.mrf.mxu0  ;;  %v1438_v1 = vpop.f32.mrf.mxu1 }
 0x211   : > { %v1326_v2 = vpop.f32.mrf.mxu0  ;;  %v1439_v3 = vpop.f32.mrf.mxu1 }
 0x213   : > { %v1327_v4 = vpop.f32.mrf.mxu0  ;;  %v1440_v5 = vpop.f32.mrf.mxu1 }
 0x231   : > { %v1550_v7 = vpop.f32.mrf.mxu0  ;;  %v1664_v8 = vpop.f32.mrf.mxu1 }
 0x232   : > { %v1556_v9 = vmax.f32 %v1442_v6, %v1550_v7 }
 0x233   : > { %v1552_v11 = vpop.f32.mrf.mxu0  ;;  %v1666_v12 = vpop.f32.mrf.mxu1 }
 0x234   : > { %v1670_v13 = vmax.f32 %v1556_v9, %v1664_v8 }
 0x235   : > { %v1553_v14 = vpop.f32.mrf.mxu0  ;;  %v1667_v15 = vpop.f32.mrf.mxu1 }
 0x236   : > { %v1678_v16 = vadd.f32 %v2278_v10, %v1670_v13 }
 0x237   : > { %v1554_v17 = vpop.f32.mrf.mxu0  ;;  %v1668_v18 = vpop.f32.mrf.mxu1 }
 0x238   : > { %v1679_v19 = vmax.f32 %v1678_v16, 0.0 }
 0x23a   : > { %v1680_v21 = vpack.c.bf16 %v1679_v19, %v1679_v19 }
 0x23c   : > { %2314 = vmatmul.mubr.msk.bf16.vlgmr.msra.gmra.mxu1 %vm1704_vm4, %v1680_v21 }
 0x23d   : > { %2318 = vmatpush3.bf16.msra.mxu1 %v2571_v20  ;;  %2321 = vmatprep.mubr.msk.bf16.mxu1 %vm2645_vm3, %v2644_v61 }
 0x23e   : > { %2319 = vmatprep.subr.bf16.mxu1 %v2644_v61 }
 0x241   : > { %2320 = vmatpush3.bf16.msra.mxu1 %v2572_v22 }
 0x2fc   : > { %v1742_v27 = vpop.f32.mrf.mxu1 }
 0x2fd   : > { %v1743_v28 = vadd.f32 %v2279_v26, %v1742_v27 }
 0x2fe   : > { %v2315_v29 = vpop.f32.mrf.mxu1 }
 0x2ff   : > { %v1748_v30 = vmax.f32 %v1743_v28, 0.0 }
 0x300   : > { %v1745_v31 = vpop.f32.mrf.mxu1 }
 0x301   : > { %v1749_v32 = vpack.c.bf16 %v1748_v30, %v1748_v30 }
 0x302   : > { %v2316_v33 = vpop.f32.mrf.mxu1 }
 0x303   : > { %2322 = vmatmul.mubr.msk.bf16.vlgmr.msra.gmra.mxu1 %vm1704_vm4, %v1749_v32 }
 0x3c3   : > { %v1810_v37 = vpop.f32.mrf.mxu1 }
 0x3c4   : > { %v1811_v38 = vadd.f32 %v2283_v36, %v1810_v37 }
 0x3c5   : > { %v2323_v39 = vpop.f32.mrf.mxu1 }
 0x3c6   : > { %v1816_v40 = vmax.f32 %v1811_v38, 0.0 }
 0x3c7   : > { %v1813_v41 = vpop.f32.mrf.mxu1 }
 0x3c8   : > { %v1817_v42 = vpack.c.bf16 %v1816_v40, %v1816_v40 }
 0x3c9   : > { %v2324_v43 = vpop.f32.mrf.mxu1 }
 0x3ca   : > { %2334 = vmatmul.mubr.msk.bf16.vlgmr.msra.gmra.mxu0 %vm1853_vm6, %v1817_v42 }
 0x48a   : > { %v1895_v45 = vpop.f32.mrf.mxu0 }
 0x48b   : > { %v1896_v46 = vadd.f32 %v2287_v44, %v1895_v45 }
 0x48c   : > { %v2335_v47 = vpop.f32.mrf.mxu0 }
 0x48d   : > { %v1902_v48 = vsel %vm1901_vm7, %v1896_v46, -inf }
 0x48e   : > { %1903 = vmax.xlane.f32.xlu0 %v1902_v48  ;;  %v1898_v49 = vpop.f32.mrf.mxu0 }
 0x490   : > { %v2336_v50 = vpop.f32.mrf.mxu0 }
 0x517   : > { %v1904_v51 = vpop.xlane.xlu0 %1903 }
 0x518   : > { %v1905_v52 = vsub.f32 %v1896_v46, %v1904_v51 }
 0x51a   : > { %v1906_v54 = vmul.f32 1.442695, %v1905_v52 }
 0x51c   : > { %2577 = vpow2.f32 %v1906_v54 }
 0x529   : > { %v2578_v55 = vpop.eup %2577 }
 0x52a   : > { %v1908_v56 = vsel %vm1901_vm7, %v2578_v55, 0.0 }
 0x52b   : > { %1909 = vadd.xlane.f32.xlu0 %v1908_v56 }
 0x5b4   : > { %v1910_v57 = vpop.xlane.xlu0 %1909 }
 0x5b5   : > { %2579 = vlog2.f32 %v1910_v57 }
 0x5c2   : > { %v2580_v58 = vpop.eup %2579 }
 0x5c3   : > { %v1912_v59 = vmul.f32 0.6931472, %v2580_v58 }
 0x5c5   : > { %v1913_v60 = vsub.f32 %v1905_v52, %v1912_v59 }
 0x5c7   : > { %1914 = vst.msk [vmem:[%s379_s13] sm:$0xff] %vm1901_vm7, %v1913_v60 }
 0x5c8   : > { %2594 = shalt.err (!%p2591_p3)
}
 0x5c9   : > { %s2595_s30 = scalar_lea.hbm %s1927_s22, 128  ;;  %s2599_s13 = scalar_lea.hbm %s3314_s11, 256 }
 0x5ca   : > { %p2596_p4 = scmp.ne.s32.totalorder %s1927_s22, %s2595_s30  ;;  %p2600_p9 = scmp.lt.s32.totalorder %s1927_s22, %s3314_s11 }
 0x5cb   : > { %p2601_p10 = scmp.lt.s32.totalorder %s2599_s13, %s2595_s30 }
 0x5cc   : > { %p2597_p7 = pnand %p2596_p4, %p2745_p5 }
 0x5cd   : > { %p2602_p11 = por %p2601_p10, %p2600_p9 }
 0x5ce   : > { %p2598_p8 = pneg %p2597_p7 }
 0x5d0   : > { %p2603_p12 = pnand %p2602_p11, %p2598_p8 }
 0x5d2   : > { %2606 = shalt.err (!%p2603_p12)
}
 0x5d3   : > { %2337 = dma.vmem_to_hbm [thread:$0]  (%p2745_p5), %s1930_s15, 128, %s1927_s22, %s1916_s24  }
 0x5d4 PF: > { %p2343_p13 = scmp.ge.s32.totalorder %s2641_s20, 2  ;;  %s1941_s0 = sand.u32 1, %s2629_s17  }
 0x5d5   : > { %s1942_s25 = scalar_lea.sflag [#allocation3], %s1941_s0 }
 0x5d6   : > { %p2340_p0 = pnand %p2343_p13, %p2749_p6 }
 0x5d8   : > { %p2341_p1 = pneg %p2340_p0 }
 0x5da   : > { %2624 = dma.done.wait (%p2341_p1), %s1942_s25, 128  }
 0x5db   : > { %2626 = vsyncadd (%p2341_p1), %s1942_s25, 4294967168  ;;  %s3320_s29 = sld [smem:[#allocation5_spill]]  ;;  %p21_p2 = scmp.ge.s32.totalorder %s2732_s23, 4  }
 0x5dc   : > { %s3321_s17 = smov %s2633_s18  ;;  %s3322_s18 = smov %s2637_s19 }
 0x5dd   : > { %s3324_s20 = smov %s2732_s23  ;;  %23 = sbr.rel (!%p21_p2) target bundleno = 5 (0x5), region = 105 }
 0x5e1   : > { %s3323_s19 = smov %s3320_s29 }
 0x5e2   :  { %1947 = vsyncpa [#allocation3], 1 }
 0x5e3   :  { %1949 = vsyncpa [#allocation3 + $0x1], 1 }

</bundles_post_ra>
